<compile_context>
chip_gen: v5e
topology: v5e:2x2
jax: 0.10.0
libtpu: 0.0.40
codegen_flags: <defaults>
</compile_context>

<pallas_src>
import functools

import jax
import jax.numpy as jnp
from jax.experimental import pallas as pl
from jax.experimental.pallas import tpu as pltpu


def _channel_gate_kernel(x_ref, w1t_ref, b1_ref, w2_ref, b2_ref, o_ref, *, hw):
    """One (TB, C, HWp) block of batch elements per grid step.

    x_ref:   (TB, C, HWp) input (native dtype), spatial on lanes, C on sublanes
    w1t_ref: (C, Hd)      first Linear weight transposed (torch weight is (Hd, C))
    b1_ref:  (1, Hd)      first Linear bias
    w2_ref:  (C, Hd)      second Linear weight (torch layout)
    b2_ref:  (C, 1)       second Linear bias as a column
    o_ref:   (TB, C, HWp) output, same dtype as the input
    """
    xf = x_ref[...].astype(jnp.float32)                  # (TB, C, HWp), f32 math
    tb, c, hwp = xf.shape
    hidden = w1t_ref.shape[1]

    # Global pools over the spatial (lane) axis -> (TB, C, 1) columns.
    avg = jnp.sum(xf, axis=2, keepdims=True) * jnp.float32(1.0 / hw)
    if hwp != hw:
        # Lane padding is zero (wrapper pad): sum/avg unaffected; mask it for max.
        lane = jax.lax.broadcasted_iota(jnp.int32, (1, 1, hwp), 2)
        mx = jnp.max(jnp.where(lane < hw, xf, -jnp.inf), axis=2, keepdims=True)
    else:
        mx = jnp.max(xf, axis=2, keepdims=True)

    # Shared MLP  Linear(C->hidden) -> ReLU -> Linear(hidden->C)  applied to both
    # pooled columns; the two branches share one layer-2 accumulator (b2 counted
    # twice, matching mlp(avg) + mlp(max)).  Pure VPU/XLU broadcast-multiply +
    # reductions; `hidden` = C // reduction is tiny so the unrolled loop is cheap.
    att = jnp.zeros((tb, c, 1), jnp.float32) + 2.0 * b2_ref[...]   # (TB, C, 1)
    for pooled in (avg, mx):
        for j in range(hidden):
            # h_j[b] = relu( sum_c W1[j, c] * pooled[b, c] + b1[j] )
            hj = jnp.sum(pooled * w1t_ref[:, j:j + 1], axis=1, keepdims=True)  # (TB,1,1)
            hj = jnp.maximum(hj + b1_ref[0:1, j:j + 1], 0.0)
            # att[b, c] += h_j[b] * W2[c, j]
            att = att + hj * w2_ref[:, j:j + 1]

    gate = 1.0 - jax.nn.sigmoid(att)                     # (TB, C, 1), broadcasts on lanes
    o_ref[...] = (xf * gate).astype(o_ref.dtype)


def _choose_batch_tile(n, per_elem_bytes):
    """Batch elements per block (TB)."""
    # Double-buffered in + out blocks cost ~4 * TB * per_elem bytes; keep under
    # ~10 MiB so v5e's 16 MiB default scoped-VMEM limit has headroom
    # (v6e/v7x defaults are 32 MiB).
    vmem_cap = max(1, (10 * 1024 * 1024) // (4 * per_elem_bytes))
    # ~1 MiB blocks already sit near the HBM roofline and amortize the ~0.35 us
    # per-grid-step overhead.
    target = max(1, (1 * 1024 * 1024) // per_elem_bytes)
    tb_cap = min(n, vmem_cap, target)
    if n >= 2:
        # Keep the grid length >= 2 so both of v7x's TensorCores get a step
        # ("parallel" grid axis); costs at most one extra ~0.35 us step on
        # single-TC v5e/v6e, which is negligible.
        tb_cap = max(1, min(tb_cap, n // 2))
    # Largest divisor of n not exceeding the cap (avoids partial trailing blocks).
    tb = 1
    for d in range(1, tb_cap + 1):
        if n % d == 0:
            tb = d
    return tb


@jax.jit
def channel_gate(x_nchw, w1, b1, w2, b2):
    """ChannelGate forward.

    x_nchw: (N, C, H, W) in any float dtype (output keeps this dtype)
    w1: (Hd, C), b1: (Hd,), w2: (C, Hd), b2: (C,)   -- torch nn.Linear layouts
    """
    N, C, H, W = x_nchw.shape
    Hd = w1.shape[0]
    HW = H * W
    HWp = ((HW + 127) // 128) * 128            # lane-dense loads/stores for any H, W
    dtype = x_nchw.dtype
    itemsize = jnp.dtype(dtype).itemsize

    # Free view of the contiguous NCHW buffer; pad the lane axis only if needed.
    x = x_nchw.reshape(N, C, HW)
    if HWp != HW:
        x = jnp.pad(x, ((0, 0), (0, 0), (0, HWp - HW)))

    # Tiny weights, precast to f32 once (negligible).
    w1t = jnp.transpose(w1).astype(jnp.float32)          # (C, Hd)
    b1r = b1.reshape(1, Hd).astype(jnp.float32)          # (1, Hd)
    w2f = w2.astype(jnp.float32)                         # (C, Hd)
    b2c = b2.reshape(C, 1).astype(jnp.float32)           # (C, 1)

    per_elem_bytes = C * HWp * itemsize
    TB = _choose_batch_tile(N, per_elem_bytes)
    grid = (N // TB,)

    cost = pl.CostEstimate(
        flops=int(3 * N * C * HW + 8 * N * C * Hd),
        transcendentals=int(N * C),
        bytes_accessed=int(2 * N * C * HWp * itemsize),
    )

    out = pl.pallas_call(
        functools.partial(_channel_gate_kernel, hw=HW),
        out_shape=jax.ShapeDtypeStruct((N, C, HWp), dtype),
        grid=grid,
        in_specs=[
            pl.BlockSpec((TB, C, HWp), lambda n: (n, 0, 0)),
            pl.BlockSpec((C, Hd), lambda n: (0, 0)),
            pl.BlockSpec((1, Hd), lambda n: (0, 0)),
            pl.BlockSpec((C, Hd), lambda n: (0, 0)),
            pl.BlockSpec((C, 1), lambda n: (0, 0)),
        ],
        out_specs=pl.BlockSpec((TB, C, HWp), lambda n: (n, 0, 0)),
        compiler_params=pltpu.CompilerParams(
            dimension_semantics=("parallel",)),
        cost_estimate=cost,
    )(x, w1t, b1r, w2f, b2c)

    if HWp != HW:
        out = out[:, :, :HW]
    return out.reshape(N, C, H, W)


def _reference(x, w1, b1, w2, b2):
    N, C, H, W = x.shape
    xf = x.astype(jnp.float32).reshape(N, C, H * W)
    avg = jnp.mean(xf, axis=2)                 # (N, C)
    mx = jnp.max(xf, axis=2)                   # (N, C)

    def mlp(v):
        h = jnp.maximum(v @ w1.T + b1, 0.0)
        return h @ w2.T + b2

    att = mlp(avg) + mlp(mx)                   # (N, C)
    scale = jax.nn.sigmoid(att)[:, :, None, None]
    return x.astype(jnp.float32) * (1.0 - scale)


if __name__ == "__main__":
    # ChannelGate(gate_channels=64, reduction_ration=16) -> hidden = 4.
    N, C, H, W = 2, 64, 16, 16
    reduction = 16
    Hd = C // reduction

    key = jax.random.PRNGKey(0)
    k_x, k_w1, k_b1, k_w2, k_b2 = jax.random.split(key, 5)

    x = jax.random.normal(k_x, (N, C, H, W), jnp.float32)
    # nn.Linear weights: (out_features, in_features), biases: (out_features,)
    w1 = jax.random.normal(k_w1, (Hd, C), jnp.float32) * 0.2
    b1 = jax.random.normal(k_b1, (Hd,), jnp.float32) * 0.1
    w2 = jax.random.normal(k_w2, (C, Hd), jnp.float32) * 0.2
    b2 = jax.random.normal(k_b2, (C,), jnp.float32) * 0.1

    # f32 path
    out = jax.block_until_ready(channel_gate(x, w1, b1, w2, b2))
    ref = _reference(x, w1, b1, w2, b2)
    assert out.shape == (N, C, H, W)
    assert out.dtype == x.dtype
    assert jnp.allclose(out, ref, atol=1e-4, rtol=1e-4), "f32 mismatch vs reference"

    # Native-dtype path: bf16 in -> bf16 out (no wrapper-side upcast pass).
    xb = x.astype(jnp.bfloat16)
    out_b = jax.block_until_ready(channel_gate(xb, w1, b1, w2, b2))
    ref_b = _reference(xb, w1, b1, w2, b2)
    assert out_b.dtype == jnp.bfloat16
    assert jnp.allclose(out_b.astype(jnp.float32), ref_b, atol=5e-2, rtol=5e-2), \
        "bf16 mismatch vs reference"

    print("KERNEL_OK")
</pallas_src>

<mosaic_0001>
module attributes {stable_mosaic.version = 11 : i64} {
  func.func @_channel_gate_kernel(%arg0: i32, %arg1: memref<1x64x256xf32, #tpu.memory_space<vmem>>, %arg2: memref<64x4xf32, #tpu.memory_space<vmem>>, %arg3: memref<1x4xf32, #tpu.memory_space<vmem>>, %arg4: memref<64x4xf32, #tpu.memory_space<vmem>>, %arg5: memref<64x1xf32, #tpu.memory_space<vmem>>, %arg6: memref<1x64x256xf32, #tpu.memory_space<vmem>>) attributes {dimension_semantics = [#tpu.dimension_semantics<parallel>], iteration_bounds = array<i64: 2>, scalar_prefetch = 0 : i64, scratch_operands = 0 : i64, tpu.core_type = #tpu.core_type<tc>, window_params = [{transform_indices = @transform_0, window_bounds = array<i64: 1, 64, 256>}, {pipeline_mode = #tpu.pipeline_mode<synchronous>, transform_indices = @transform_1, window_bounds = array<i64: 64, 4>}, {pipeline_mode = #tpu.pipeline_mode<synchronous>, transform_indices = @transform_2, window_bounds = array<i64: 1, 4>}, {pipeline_mode = #tpu.pipeline_mode<synchronous>, transform_indices = @transform_3, window_bounds = array<i64: 64, 4>}, {pipeline_mode = #tpu.pipeline_mode<synchronous>, transform_indices = @transform_4, window_bounds = array<i64: 64, 1>}, {transform_indices = @transform_5, window_bounds = array<i64: 1, 64, 256>}]} {
    %c0 = arith.constant 0 : index
    %c0_0 = arith.constant 0 : index
    %c0_1 = arith.constant 0 : index
    %0 = vector.load %arg1[%c0, %c0_0, %c0_1] : memref<1x64x256xf32, #tpu.memory_space<vmem>>, vector<1x64x256xf32>
    %cst = arith.constant dense<0.000000e+00> : vector<1x64xf32>
    %1 = vector.multi_reduction <add>, %0, %cst [2] : vector<1x64x256xf32> to vector<1x64xf32>
    %2 = vector.shape_cast %1 : vector<1x64xf32> to vector<1x64x1xf32>
    %cst_2 = arith.constant 3.906250e-03 : f32
    %3 = vector.broadcast %cst_2 : f32 to vector<1x64x1xf32>
    %4 = arith.mulf %2, %3 : vector<1x64x1xf32>
    %cst_3 = arith.constant dense<0xFF800000> : vector<1x64xf32>
    %5 = vector.multi_reduction <maximumf>, %0, %cst_3 [2] : vector<1x64x256xf32> to vector<1x64xf32>
    %6 = vector.shape_cast %5 : vector<1x64xf32> to vector<1x64x1xf32>
    %cst_4 = arith.constant 0.000000e+00 : f32
    %7 = vector.broadcast %cst_4 : f32 to vector<1x64x1xf32>
    %c0_5 = arith.constant 0 : index
    %c0_6 = arith.constant 0 : index
    %8 = vector.load %arg5[%c0_5, %c0_6] : memref<64x1xf32, #tpu.memory_space<vmem>>, vector<64x1xf32>
    %cst_7 = arith.constant 2.000000e+00 : f32
    %9 = vector.broadcast %cst_7 : f32 to vector<64x1xf32>
    %10 = arith.mulf %9, %8 : vector<64x1xf32>
    %11 = vector.shape_cast %10 : vector<64x1xf32> to vector<1x64x1xf32>
    %12 = arith.addf %7, %11 : vector<1x64x1xf32>
    %c0_8 = arith.constant 0 : index
    %c0_9 = arith.constant 0 : index
    %13 = vector.load %arg2[%c0_8, %c0_9] : memref<64x4xf32, #tpu.memory_space<vmem>>, vector<64x1xf32>
    %14 = vector.shape_cast %13 : vector<64x1xf32> to vector<1x64x1xf32>
    %15 = arith.mulf %4, %14 : vector<1x64x1xf32>
    %cst_10 = arith.constant dense<0.000000e+00> : vector<1x1xf32>
    %16 = vector.multi_reduction <add>, %15, %cst_10 [1] : vector<1x64x1xf32> to vector<1x1xf32>
    %17 = vector.shape_cast %16 : vector<1x1xf32> to vector<1x1x1xf32>
    %c0_11 = arith.constant 0 : index
    %c0_12 = arith.constant 0 : index
    %18 = vector.load %arg3[%c0_11, %c0_12] : memref<1x4xf32, #tpu.memory_space<vmem>>, vector<1x1xf32>
    %19 = vector.shape_cast %18 : vector<1x1xf32> to vector<1x1x1xf32>
    %20 = arith.addf %17, %19 : vector<1x1x1xf32>
    %cst_13 = arith.constant 0.000000e+00 : f32
    %21 = vector.broadcast %cst_13 : f32 to vector<1x1x1xf32>
    %22 = arith.maximumf %20, %21 : vector<1x1x1xf32>
    %c0_14 = arith.constant 0 : index
    %c0_15 = arith.constant 0 : index
    %23 = vector.load %arg4[%c0_14, %c0_15] : memref<64x4xf32, #tpu.memory_space<vmem>>, vector<64x1xf32>
    %24 = vector.shape_cast %23 : vector<64x1xf32> to vector<1x64x1xf32>
    %25 = vector.broadcast %22 : vector<1x1x1xf32> to vector<1x64x1xf32>
    %26 = arith.mulf %25, %24 : vector<1x64x1xf32>
    %27 = arith.addf %12, %26 : vector<1x64x1xf32>
    %c0_16 = arith.constant 0 : index
    %c1 = arith.constant 1 : index
    %28 = vector.load %arg2[%c0_16, %c1] : memref<64x4xf32, #tpu.memory_space<vmem>>, vector<64x1xf32>
    %29 = vector.shape_cast %28 : vector<64x1xf32> to vector<1x64x1xf32>
    %30 = arith.mulf %4, %29 : vector<1x64x1xf32>
    %cst_17 = arith.constant dense<0.000000e+00> : vector<1x1xf32>
    %31 = vector.multi_reduction <add>, %30, %cst_17 [1] : vector<1x64x1xf32> to vector<1x1xf32>
    %32 = vector.shape_cast %31 : vector<1x1xf32> to vector<1x1x1xf32>
    %c0_18 = arith.constant 0 : index
    %c1_19 = arith.constant 1 : index
    %33 = vector.load %arg3[%c0_18, %c1_19] : memref<1x4xf32, #tpu.memory_space<vmem>>, vector<1x1xf32>
    %34 = vector.shape_cast %33 : vector<1x1xf32> to vector<1x1x1xf32>
    %35 = arith.addf %32, %34 : vector<1x1x1xf32>
    %cst_20 = arith.constant 0.000000e+00 : f32
    %36 = vector.broadcast %cst_20 : f32 to vector<1x1x1xf32>
    %37 = arith.maximumf %35, %36 : vector<1x1x1xf32>
    %c0_21 = arith.constant 0 : index
    %c1_22 = arith.constant 1 : index
    %38 = vector.load %arg4[%c0_21, %c1_22] : memref<64x4xf32, #tpu.memory_space<vmem>>, vector<64x1xf32>
    %39 = vector.shape_cast %38 : vector<64x1xf32> to vector<1x64x1xf32>
    %40 = vector.broadcast %37 : vector<1x1x1xf32> to vector<1x64x1xf32>
    %41 = arith.mulf %40, %39 : vector<1x64x1xf32>
    %42 = arith.addf %27, %41 : vector<1x64x1xf32>
    %c0_23 = arith.constant 0 : index
    %c2 = arith.constant 2 : index
    %43 = vector.load %arg2[%c0_23, %c2] : memref<64x4xf32, #tpu.memory_space<vmem>>, vector<64x1xf32>
    %44 = vector.shape_cast %43 : vector<64x1xf32> to vector<1x64x1xf32>
    %45 = arith.mulf %4, %44 : vector<1x64x1xf32>
    %cst_24 = arith.constant dense<0.000000e+00> : vector<1x1xf32>
    %46 = vector.multi_reduction <add>, %45, %cst_24 [1] : vector<1x64x1xf32> to vector<1x1xf32>
    %47 = vector.shape_cast %46 : vector<1x1xf32> to vector<1x1x1xf32>
    %c0_25 = arith.constant 0 : index
    %c2_26 = arith.constant 2 : index
    %48 = vector.load %arg3[%c0_25, %c2_26] : memref<1x4xf32, #tpu.memory_space<vmem>>, vector<1x1xf32>
    %49 = vector.shape_cast %48 : vector<1x1xf32> to vector<1x1x1xf32>
    %50 = arith.addf %47, %49 : vector<1x1x1xf32>
    %cst_27 = arith.constant 0.000000e+00 : f32
    %51 = vector.broadcast %cst_27 : f32 to vector<1x1x1xf32>
    %52 = arith.maximumf %50, %51 : vector<1x1x1xf32>
    %c0_28 = arith.constant 0 : index
    %c2_29 = arith.constant 2 : index
    %53 = vector.load %arg4[%c0_28, %c2_29] : memref<64x4xf32, #tpu.memory_space<vmem>>, vector<64x1xf32>
    %54 = vector.shape_cast %53 : vector<64x1xf32> to vector<1x64x1xf32>
    %55 = vector.broadcast %52 : vector<1x1x1xf32> to vector<1x64x1xf32>
    %56 = arith.mulf %55, %54 : vector<1x64x1xf32>
    %57 = arith.addf %42, %56 : vector<1x64x1xf32>
    %c0_30 = arith.constant 0 : index
    %c3 = arith.constant 3 : index
    %58 = vector.load %arg2[%c0_30, %c3] : memref<64x4xf32, #tpu.memory_space<vmem>>, vector<64x1xf32>
    %59 = vector.shape_cast %58 : vector<64x1xf32> to vector<1x64x1xf32>
    %60 = arith.mulf %4, %59 : vector<1x64x1xf32>
    %cst_31 = arith.constant dense<0.000000e+00> : vector<1x1xf32>
    %61 = vector.multi_reduction <add>, %60, %cst_31 [1] : vector<1x64x1xf32> to vector<1x1xf32>
    %62 = vector.shape_cast %61 : vector<1x1xf32> to vector<1x1x1xf32>
    %c0_32 = arith.constant 0 : index
    %c3_33 = arith.constant 3 : index
    %63 = vector.load %arg3[%c0_32, %c3_33] : memref<1x4xf32, #tpu.memory_space<vmem>>, vector<1x1xf32>
    %64 = vector.shape_cast %63 : vector<1x1xf32> to vector<1x1x1xf32>
    %65 = arith.addf %62, %64 : vector<1x1x1xf32>
    %cst_34 = arith.constant 0.000000e+00 : f32
    %66 = vector.broadcast %cst_34 : f32 to vector<1x1x1xf32>
    %67 = arith.maximumf %65, %66 : vector<1x1x1xf32>
    %c0_35 = arith.constant 0 : index
    %c3_36 = arith.constant 3 : index
    %68 = vector.load %arg4[%c0_35, %c3_36] : memref<64x4xf32, #tpu.memory_space<vmem>>, vector<64x1xf32>
    %69 = vector.shape_cast %68 : vector<64x1xf32> to vector<1x64x1xf32>
    %70 = vector.broadcast %67 : vector<1x1x1xf32> to vector<1x64x1xf32>
    %71 = arith.mulf %70, %69 : vector<1x64x1xf32>
    %72 = arith.addf %57, %71 : vector<1x64x1xf32>
    %c0_37 = arith.constant 0 : index
    %c0_38 = arith.constant 0 : index
    %73 = vector.load %arg2[%c0_37, %c0_38] : memref<64x4xf32, #tpu.memory_space<vmem>>, vector<64x1xf32>
    %74 = vector.shape_cast %73 : vector<64x1xf32> to vector<1x64x1xf32>
    %75 = arith.mulf %6, %74 : vector<1x64x1xf32>
    %cst_39 = arith.constant dense<0.000000e+00> : vector<1x1xf32>
    %76 = vector.multi_reduction <add>, %75, %cst_39 [1] : vector<1x64x1xf32> to vector<1x1xf32>
    %77 = vector.shape_cast %76 : vector<1x1xf32> to vector<1x1x1xf32>
    %c0_40 = arith.constant 0 : index
    %c0_41 = arith.constant 0 : index
    %78 = vector.load %arg3[%c0_40, %c0_41] : memref<1x4xf32, #tpu.memory_space<vmem>>, vector<1x1xf32>
    %79 = vector.shape_cast %78 : vector<1x1xf32> to vector<1x1x1xf32>
    %80 = arith.addf %77, %79 : vector<1x1x1xf32>
    %cst_42 = arith.constant 0.000000e+00 : f32
    %81 = vector.broadcast %cst_42 : f32 to vector<1x1x1xf32>
    %82 = arith.maximumf %80, %81 : vector<1x1x1xf32>
    %c0_43 = arith.constant 0 : index
    %c0_44 = arith.constant 0 : index
    %83 = vector.load %arg4[%c0_43, %c0_44] : memref<64x4xf32, #tpu.memory_space<vmem>>, vector<64x1xf32>
    %84 = vector.shape_cast %83 : vector<64x1xf32> to vector<1x64x1xf32>
    %85 = vector.broadcast %82 : vector<1x1x1xf32> to vector<1x64x1xf32>
    %86 = arith.mulf %85, %84 : vector<1x64x1xf32>
    %87 = arith.addf %72, %86 : vector<1x64x1xf32>
    %c0_45 = arith.constant 0 : index
    %c1_46 = arith.constant 1 : index
    %88 = vector.load %arg2[%c0_45, %c1_46] : memref<64x4xf32, #tpu.memory_space<vmem>>, vector<64x1xf32>
    %89 = vector.shape_cast %88 : vector<64x1xf32> to vector<1x64x1xf32>
    %90 = arith.mulf %6, %89 : vector<1x64x1xf32>
    %cst_47 = arith.constant dense<0.000000e+00> : vector<1x1xf32>
    %91 = vector.multi_reduction <add>, %90, %cst_47 [1] : vector<1x64x1xf32> to vector<1x1xf32>
    %92 = vector.shape_cast %91 : vector<1x1xf32> to vector<1x1x1xf32>
    %c0_48 = arith.constant 0 : index
    %c1_49 = arith.constant 1 : index
    %93 = vector.load %arg3[%c0_48, %c1_49] : memref<1x4xf32, #tpu.memory_space<vmem>>, vector<1x1xf32>
    %94 = vector.shape_cast %93 : vector<1x1xf32> to vector<1x1x1xf32>
    %95 = arith.addf %92, %94 : vector<1x1x1xf32>
    %cst_50 = arith.constant 0.000000e+00 : f32
    %96 = vector.broadcast %cst_50 : f32 to vector<1x1x1xf32>
    %97 = arith.maximumf %95, %96 : vector<1x1x1xf32>
    %c0_51 = arith.constant 0 : index
    %c1_52 = arith.constant 1 : index
    %98 = vector.load %arg4[%c0_51, %c1_52] : memref<64x4xf32, #tpu.memory_space<vmem>>, vector<64x1xf32>
    %99 = vector.shape_cast %98 : vector<64x1xf32> to vector<1x64x1xf32>
    %100 = vector.broadcast %97 : vector<1x1x1xf32> to vector<1x64x1xf32>
    %101 = arith.mulf %100, %99 : vector<1x64x1xf32>
    %102 = arith.addf %87, %101 : vector<1x64x1xf32>
    %c0_53 = arith.constant 0 : index
    %c2_54 = arith.constant 2 : index
    %103 = vector.load %arg2[%c0_53, %c2_54] : memref<64x4xf32, #tpu.memory_space<vmem>>, vector<64x1xf32>
    %104 = vector.shape_cast %103 : vector<64x1xf32> to vector<1x64x1xf32>
    %105 = arith.mulf %6, %104 : vector<1x64x1xf32>
    %cst_55 = arith.constant dense<0.000000e+00> : vector<1x1xf32>
    %106 = vector.multi_reduction <add>, %105, %cst_55 [1] : vector<1x64x1xf32> to vector<1x1xf32>
    %107 = vector.shape_cast %106 : vector<1x1xf32> to vector<1x1x1xf32>
    %c0_56 = arith.constant 0 : index
    %c2_57 = arith.constant 2 : index
    %108 = vector.load %arg3[%c0_56, %c2_57] : memref<1x4xf32, #tpu.memory_space<vmem>>, vector<1x1xf32>
    %109 = vector.shape_cast %108 : vector<1x1xf32> to vector<1x1x1xf32>
    %110 = arith.addf %107, %109 : vector<1x1x1xf32>
    %cst_58 = arith.constant 0.000000e+00 : f32
    %111 = vector.broadcast %cst_58 : f32 to vector<1x1x1xf32>
    %112 = arith.maximumf %110, %111 : vector<1x1x1xf32>
    %c0_59 = arith.constant 0 : index
    %c2_60 = arith.constant 2 : index
    %113 = vector.load %arg4[%c0_59, %c2_60] : memref<64x4xf32, #tpu.memory_space<vmem>>, vector<64x1xf32>
    %114 = vector.shape_cast %113 : vector<64x1xf32> to vector<1x64x1xf32>
    %115 = vector.broadcast %112 : vector<1x1x1xf32> to vector<1x64x1xf32>
    %116 = arith.mulf %115, %114 : vector<1x64x1xf32>
    %117 = arith.addf %102, %116 : vector<1x64x1xf32>
    %c0_61 = arith.constant 0 : index
    %c3_62 = arith.constant 3 : index
    %118 = vector.load %arg2[%c0_61, %c3_62] : memref<64x4xf32, #tpu.memory_space<vmem>>, vector<64x1xf32>
    %119 = vector.shape_cast %118 : vector<64x1xf32> to vector<1x64x1xf32>
    %120 = arith.mulf %6, %119 : vector<1x64x1xf32>
    %cst_63 = arith.constant dense<0.000000e+00> : vector<1x1xf32>
    %121 = vector.multi_reduction <add>, %120, %cst_63 [1] : vector<1x64x1xf32> to vector<1x1xf32>
    %122 = vector.shape_cast %121 : vector<1x1xf32> to vector<1x1x1xf32>
    %c0_64 = arith.constant 0 : index
    %c3_65 = arith.constant 3 : index
    %123 = vector.load %arg3[%c0_64, %c3_65] : memref<1x4xf32, #tpu.memory_space<vmem>>, vector<1x1xf32>
    %124 = vector.shape_cast %123 : vector<1x1xf32> to vector<1x1x1xf32>
    %125 = arith.addf %122, %124 : vector<1x1x1xf32>
    %cst_66 = arith.constant 0.000000e+00 : f32
    %126 = vector.broadcast %cst_66 : f32 to vector<1x1x1xf32>
    %127 = arith.maximumf %125, %126 : vector<1x1x1xf32>
    %c0_67 = arith.constant 0 : index
    %c3_68 = arith.constant 3 : index
    %128 = vector.load %arg4[%c0_67, %c3_68] : memref<64x4xf32, #tpu.memory_space<vmem>>, vector<64x1xf32>
    %129 = vector.shape_cast %128 : vector<64x1xf32> to vector<1x64x1xf32>
    %130 = vector.broadcast %127 : vector<1x1x1xf32> to vector<1x64x1xf32>
    %131 = arith.mulf %130, %129 : vector<1x64x1xf32>
    %132 = arith.addf %117, %131 : vector<1x64x1xf32>
    %133 = arith.negf %132 : vector<1x64x1xf32>
    %134 = math.exp %133 : vector<1x64x1xf32>
    %cst_69 = arith.constant 1.000000e+00 : f32
    %135 = vector.broadcast %cst_69 : f32 to vector<1x64x1xf32>
    %136 = arith.addf %135, %134 : vector<1x64x1xf32>
    %137 = arith.divf %135, %136 : vector<1x64x1xf32>
    %cst_70 = arith.constant 1.000000e+00 : f32
    %138 = vector.broadcast %cst_70 : f32 to vector<1x64x1xf32>
    %139 = arith.subf %138, %137 : vector<1x64x1xf32>
    %140 = vector.broadcast %139 : vector<1x64x1xf32> to vector<1x64x256xf32>
    %141 = arith.mulf %0, %140 : vector<1x64x256xf32>
    %c0_71 = arith.constant 0 : index
    %c0_72 = arith.constant 0 : index
    %c0_73 = arith.constant 0 : index
    %142 = vector.load %arg6[%c0_71, %c0_72, %c0_73] : memref<1x64x256xf32, #tpu.memory_space<vmem>>, vector<1x64x256xf32>
    tpu.vector_store %arg6[%c0_71, %c0_72, %c0_73], %141 {strides = array<i32>} : memref<1x64x256xf32, #tpu.memory_space<vmem>>, vector<1x64x256xf32>,
    return
  }
  func.func @transform_0(%arg0: i32) -> (i32, i32, i32) {
    %c0_i32 = arith.constant 0 : i32
    %c0_i32_0 = arith.constant 0 : i32
    %c0_i32_1 = arith.constant 0 : i32
    return %arg0, %c0_i32, %c0_i32_0 : i32, i32, i32
  }
  func.func @transform_1(%arg0: i32) -> (i32, i32) {
    %c0_i32 = arith.constant 0 : i32
    %c0_i32_0 = arith.constant 0 : i32
    %c0_i32_1 = arith.constant 0 : i32
    return %c0_i32, %c0_i32_0 : i32, i32
  }
  func.func @transform_2(%arg0: i32) -> (i32, i32) {
    %c0_i32 = arith.constant 0 : i32
    %c0_i32_0 = arith.constant 0 : i32
    %c0_i32_1 = arith.constant 0 : i32
    return %c0_i32, %c0_i32_0 : i32, i32
  }
  func.func @transform_3(%arg0: i32) -> (i32, i32) {
    %c0_i32 = arith.constant 0 : i32
    %c0_i32_0 = arith.constant 0 : i32
    %c0_i32_1 = arith.constant 0 : i32
    return %c0_i32, %c0_i32_0 : i32, i32
  }
  func.func @transform_4(%arg0: i32) -> (i32, i32) {
    %c0_i32 = arith.constant 0 : i32
    %c0_i32_0 = arith.constant 0 : i32
    %c0_i32_1 = arith.constant 0 : i32
    return %c0_i32, %c0_i32_0 : i32, i32
  }
  func.func @transform_5(%arg0: i32) -> (i32, i32, i32) {
    %c0_i32 = arith.constant 0 : i32
    %c0_i32_0 = arith.constant 0 : i32
    %c0_i32_1 = arith.constant 0 : i32
    return %arg0, %c0_i32, %c0_i32_0 : i32, i32, i32
  }
}

</mosaic_0001>

<bundles_post_ra>
// kernel: channel_gate.1
= control target key start
LH: loop header
LB: loop body
LE: loop exit
PB: predicated region body
PF: predicated region fallthrough
CT: control target
= control target key end

     0   :  { %s1283_s18 = smov 0   ;;  %s1920_s0 = inlined_call_operand.vmem [shape: f32[2,64,256], index: 0, kind: input, shape index: {}]   ;;  %s1921_s1 = inlined_call_operand.vmem [shape: f32[64,4], index: 1, kind: input, shape index: {}]   ;;  %s1922_s2 = inlined_call_operand.vmem [shape: f32[1,4], index: 2, kind: input, shape index: {}]   ;;  %s1923_s3 = inlined_call_operand.vmem [shape: f32[64,4], index: 3, kind: input, shape index: {}]   ;;  %s1924_s4 = inlined_call_operand.vmem [shape: f32[64,1], index: 4, kind: input, shape index: {}]   ;;  %s1925_s5 = inlined_call_operand.vmem [shape: f32[2,64,256], index: 5, kind: output, shape index: {}]  }
   0x1 LB: > { %s1157_s19 = sadd.s32 4294967295, %s1247_s18   ;;  %p1161_p0 = scmp.ge.s32.totalorder %s1247_s18, 1  ;;  %s1247_s18 = sphi %s1283_s18, %s15_s18  }
   0x2   : > { %p187_p1 = scmp.lt.s32.totalorder %s1247_s18, 3 }
   0x4   : > { %p188_p2 = pnand %p1161_p0, %p187_p1 }
   0x5   : > { %p215_p3 = scmp.lt.s32.totalorder (!%p188_p2), %s1157_s19, 1  ;;  %s1249_s6 = smov (!%p188_p2), 127  }
   0x6   : > { %191 = sbr.rel (%p188_p2) target bundleno = 587 (0x24b), region = 40  ;;  %s1250_s13 = smov (!%p188_p2), 126  }
   0x7   : > { %s1251_s14 = smov (!%p188_p2), 125  }
   0xb   : > { %s1929_s19 = smov (!%p215_p3, %s1157_s19), 1  ;;  %v321_v36 = vld [vmem:[%s1921_s1] sm:$0xff]  ;;  %v1323_v39 = vld [vmem:[%s1921_s1 + $0x10] sm:$0xff]  ;;  %vm337_vm0 = vcmask 7168   ;;  %vm387_vm1 = vcmask 15368   ;;  %vm460_vm2 = vcmask 23568  }
   0xc   : > { %s1176_s20 = sshll.u32 %s1929_s19, 7  ;;  %v1328_v41 = vld [vmem:[%s1921_s1 + $0x20] sm:$0xff]  ;;  %vm533_vm3 = vcmask 31768   ;;  %v1334_v44 = vld [vmem:[%s1921_s1 + $0x8] sm:$0xff]  ;;  %v1342_v51 = vld [vmem:[%s1921_s1 + $0x18] sm:$0xff] }
   0xd   : > { %s1299_s23 = scalar_lea.vmem %s1920_s0, %s1176_s20  ;;  %v1347_v52 = vld [vmem:[%s1921_s1 + $0x28] sm:$0xff]  ;;  %s1883_s12 = scalar_lea.vmem %s1925_s5, %s1176_s20 }
   0xe   : > { %v225_v0 = vld [vmem:[%s1299_s23] sm:$0xff]  ;;  %v226_v1 = vld [vmem:[%s1299_s23 + $0x8] sm:$0xff]  ;;  %v227_v9 = vld [vmem:[%s1299_s23 + $0x10] sm:$0xff] }
   0xf   : > { %v229_v2 = vld [vmem:[%s1299_s23 + $0x20] sm:$0xff]  ;;  %v241_v3 = vadd.f32 %v226_v1, %v225_v0  ;;  %v230_v4 = vld [vmem:[%s1299_s23 + $0x28] sm:$0xff]  ;;  %v228_v10 = vld [vmem:[%s1299_s23 + $0x18] sm:$0xff]  ;;  %v273_v24 = vmax.f32 %v225_v0, %v226_v1 }
  0x10   : > { %v233_v5 = vld [vmem:[%s1299_s23 + $0x40] sm:$0xff]  ;;  %v234_v6 = vld [vmem:[%s1299_s23 + $0x48] sm:$0xff]  ;;  %v247_v7 = vadd.f32 %v230_v4, %v229_v2  ;;  %v231_v11 = vld [vmem:[%s1299_s23 + $0x30] sm:$0xff]  ;;  %v244_v15 = vadd.f32 %v228_v10, %v227_v9  ;;  %v276_v25 = vmax.f32 %v227_v9, %v228_v10  ;;  %v279_v26 = vmax.f32 %v229_v2, %v230_v4 }
  0x11   : > { %v253_v8 = vadd.f32 %v234_v6, %v233_v5  ;;  %242 = vadd.xlane.f32.xlu0 %v241_v3  ;;  %v232_v12 = vld [vmem:[%s1299_s23 + $0x38] sm:$0xff]  ;;  %v235_v13 = vld [vmem:[%s1299_s23 + $0x50] sm:$0xff]  ;;  %v237_v18 = vld [vmem:[%s1299_s23 + $0x60] sm:$0xff]  ;;  %v285_v28 = vmax.f32 %v233_v5, %v234_v6 }
  0x12   : > { %248 = vadd.xlane.f32.xlu1 %v247_v7  ;;  %v236_v14 = vld [vmem:[%s1299_s23 + $0x58] sm:$0xff]  ;;  %v250_v16 = vadd.f32 %v232_v12, %v231_v11  ;;  %v238_v19 = vld [vmem:[%s1299_s23 + $0x68] sm:$0xff]  ;;  %v239_v20 = vld [vmem:[%s1299_s23 + $0x70] sm:$0xff]  ;;  %v282_v27 = vmax.f32 %v231_v11, %v232_v12 }
  0x13   : > { %254 = vadd.xlane.f32.xlu2 %v253_v8  ;;  %v256_v17 = vadd.f32 %v236_v14, %v235_v13  ;;  %v240_v21 = vld [vmem:[%s1299_s23 + $0x78] sm:$0xff]  ;;  %v259_v22 = vadd.f32 %v238_v19, %v237_v18  ;;  %v288_v29 = vmax.f32 %v235_v13, %v236_v14  ;;  %v291_v30 = vmax.f32 %v237_v18, %v238_v19  ;;  %v1370_v18 = vld [vmem:[%s1921_s1 + $0x30] sm:$0xff] }
  0x14   : > { %v262_v23 = vadd.f32 %v240_v21, %v239_v20  ;;  %v294_v31 = vmax.f32 %v239_v20, %v240_v21 }
  0x19   : > { %245 = vadd.xlane.f32.xlu0 %v244_v15 }
  0x1a   : > { %251 = vadd.xlane.f32.xlu1 %v250_v16 }
  0x1b   : > { %257 = vadd.xlane.f32.xlu2 %v256_v17 }
  0x21   : > { %260 = vadd.xlane.f32.xlu0 %v259_v22 }
  0x22   : > { %263 = vadd.xlane.f32.xlu1 %v262_v23 }
  0x23   : > { %274 = vmax.xlane.f32.xlu2 %v273_v24 }
  0x29   : > { %277 = vmax.xlane.f32.xlu0 %v276_v25 }
  0x2a   : > { %280 = vmax.xlane.f32.xlu1 %v279_v26 }
  0x2b   : > { %283 = vmax.xlane.f32.xlu2 %v282_v27 }
  0x31   : > { %286 = vmax.xlane.f32.xlu0 %v285_v28 }
  0x32   : > { %289 = vmax.xlane.f32.xlu1 %v288_v29 }
  0x33   : > { %292 = vmax.xlane.f32.xlu2 %v291_v30 }
  0x39   : > { %295 = vmax.xlane.f32.xlu0 %v294_v31 }
  0x84   : > { %v243_v32 = vpop.xlane.xlu0 %242 }
  0x85   : > { %v265_v33 = vmul.f32 0.00390625, %v243_v32  ;;  %v249_v34 = vpop.xlane.xlu1 %248 }
  0x86   : > { %v255_v35 = vpop.xlane.xlu2 %254  ;;  %v267_v37 = vmul.f32 0.00390625, %v249_v34 }
  0x87   : > { %v269_v38 = vmul.f32 0.00390625, %v255_v35  ;;  %v329_v40 = vmul.f32 %v321_v36, %v265_v33 }
  0x88   : > { %v331_v42 = vmul.f32 %v1323_v39, %v267_v37 }
  0x89   : > { %v333_v45 = vmul.f32 %v1328_v41, %v269_v38  ;;  %v338_v49 = vsel %vm337_vm0, %v329_v40, 0.0  ;;  %v388_v50 = vsel %vm387_vm1, %v329_v40, 0.0  ;;  %v461_v55 = vsel %vm460_vm2, %v329_v40, 0.0 }
  0x8a   : > { %v534_v56 = vsel %vm533_vm3, %v329_v40, 0.0  ;;  %v341_v58 = vsel %vm337_vm0, %v331_v42, 0.0  ;;  %v391_v59 = vsel %vm387_vm1, %v331_v42, 0.0  ;;  %v464_v60 = vsel %vm460_vm2, %v331_v42, 0.0 }
  0x8b   : > { %v537_v61 = vsel %vm533_vm3, %v331_v42, 0.0  ;;  %v345_v63 = vsel %vm337_vm0, %v333_v45, 0.0  ;;  %v395_v22 = vsel %vm387_vm1, %v333_v45, 0.0  ;;  %v468_v23 = vsel %vm460_vm2, %v333_v45, 0.0 }
  0x8c   : > { %v246_v43 = vpop.xlane.xlu0 %245  ;;  %v541_v24 = vsel %vm533_vm3, %v333_v45, 0.0 }
  0x8d   : > { %v266_v46 = vmul.f32 0.00390625, %v246_v43  ;;  %v252_v47 = vpop.xlane.xlu1 %251  ;;  %v1384_v43 = vld [vmem:[%s1921_s1 + $0x38] sm:$0xff] }
  0x8e   : > { %v258_v48 = vpop.xlane.xlu2 %257  ;;  %v268_v53 = vmul.f32 0.00390625, %v252_v47 }
  0x8f   : > { %v270_v54 = vmul.f32 0.00390625, %v258_v48  ;;  %v330_v57 = vmul.f32 %v1334_v44, %v266_v46 }
  0x90   : > { %v332_v62 = vmul.f32 %v1342_v51, %v268_v53 }
  0x91   : > { %v334_v0 = vmul.f32 %v1347_v52, %v270_v54  ;;  %v339_v1 = vsel %vm337_vm0, %v330_v57, 0.0  ;;  %v389_v2 = vsel %vm387_vm1, %v330_v57, 0.0  ;;  %v462_v3 = vsel %vm460_vm2, %v330_v57, 0.0 }
  0x92   : > { %v535_v4 = vsel %vm533_vm3, %v330_v57, 0.0  ;;  %v340_v5 = vadd.f32 %v339_v1, %v338_v49  ;;  %v390_v6 = vadd.f32 %v389_v2, %v388_v50  ;;  %v463_v7 = vadd.f32 %v462_v3, %v461_v55 }
  0x93   : > { %v536_v8 = vadd.f32 %v535_v4, %v534_v56  ;;  %v343_v9 = vsel %vm337_vm0, %v332_v62, 0.0  ;;  %v393_v10 = vsel %vm387_vm1, %v332_v62, 0.0  ;;  %v466_v11 = vsel %vm460_vm2, %v332_v62, 0.0 }
  0x94   : > { %v539_v12 = vsel %vm533_vm3, %v332_v62, 0.0  ;;  %v261_v13 = vpop.xlane.xlu0 %260  ;;  %v342_v14 = vadd.f32 %v341_v58, %v340_v5  ;;  %v392_v15 = vadd.f32 %v391_v59, %v390_v6  ;;  %v465_v16 = vadd.f32 %v464_v60, %v463_v7 }
  0x95   : > { %v538_v17 = vadd.f32 %v537_v61, %v536_v8  ;;  %v271_v19 = vmul.f32 0.00390625, %v261_v13  ;;  %v264_v20 = vpop.xlane.xlu1 %263  ;;  %v347_v28 = vsel %vm337_vm0, %v334_v0, 0.0  ;;  %v397_v31 = vsel %vm387_vm1, %v334_v0, 0.0 }
  0x96   : > { %v275_v21 = vpop.xlane.xlu2 %274  ;;  %v344_v26 = vadd.f32 %v343_v9, %v342_v14  ;;  %v394_v27 = vadd.f32 %v393_v10, %v392_v15  ;;  %v467_v29 = vadd.f32 %v466_v11, %v465_v16  ;;  %v272_v33 = vmul.f32 0.00390625, %v264_v20 }
  0x97   : > { %v606_v25 = vmul.f32 %v321_v36, %v275_v21  ;;  %v540_v30 = vadd.f32 %v539_v12, %v538_v17  ;;  %v335_v32 = vmul.f32 %v1370_v18, %v271_v19  ;;  %v470_v35 = vsel %vm460_vm2, %v334_v0, 0.0 }
  0x98   : > { %v543_v37 = vsel %vm533_vm3, %v334_v0, 0.0  ;;  %v346_v38 = vadd.f32 %v345_v63, %v344_v26  ;;  %v396_v40 = vadd.f32 %v395_v22, %v394_v27  ;;  %v469_v36 = vadd.f32 %v468_v23, %v467_v29 }
  0x99   : > { %v614_v34 = vsel %vm337_vm0, %v606_v25, 0.0  ;;  %v542_v42 = vadd.f32 %v541_v24, %v540_v30  ;;  %v654_v45 = vsel %vm387_vm1, %v606_v25, 0.0  ;;  %v726_v46 = vsel %vm460_vm2, %v606_v25, 0.0 }
  0x9a   : > { %v798_v47 = vsel %vm533_vm3, %v606_v25, 0.0  ;;  %v349_v48 = vsel %vm337_vm0, %v335_v32, 0.0  ;;  %v348_v49 = vadd.f32 %v347_v28, %v346_v38  ;;  %v398_v50 = vadd.f32 %v397_v31, %v396_v40 }
  0x9b   : > { %v471_v53 = vadd.f32 %v470_v35, %v469_v36  ;;  %v544_v54 = vadd.f32 %v543_v37, %v542_v42  ;;  %v399_v56 = vsel %vm387_vm1, %v335_v32, 0.0  ;;  %v472_v57 = vsel %vm460_vm2, %v335_v32, 0.0 }
  0x9c   : > { %v278_v55 = vpop.xlane.xlu0 %277  ;;  %v545_v58 = vsel %vm533_vm3, %v335_v32, 0.0  ;;  %v1394_v59 = vmul.f32 %v1384_v43, %v272_v33  ;;  %v350_v63 = vadd.f32 %v349_v48, %v348_v49  ;;  %v400_v0 = vadd.f32 %v399_v56, %v398_v50 }
  0x9d   : > { %v607_v60 = vmul.f32 %v1334_v44, %v278_v55  ;;  %v281_v61 = vpop.xlane.xlu1 %280  ;;  %v473_v1 = vadd.f32 %v472_v57, %v471_v53  ;;  %v546_v4 = vadd.f32 %v545_v58, %v544_v54 }
  0x9e   : > { %v284_v62 = vpop.xlane.xlu2 %283  ;;  %v608_v2 = vmul.f32 %v1323_v39, %v281_v61  ;;  %v351_v5 = vsel %vm337_vm0, %v1394_v59, 0.0  ;;  %v401_v33 = vsel %vm387_vm1, %v1394_v59, 0.0 }
  0x9f   : > { %v609_v3 = vmul.f32 %v1342_v51, %v284_v62  ;;  %v615_v6 = vsel %vm337_vm0, %v607_v60, 0.0  ;;  %v655_v7 = vsel %vm387_vm1, %v607_v60, 0.0  ;;  %v727_v8 = vsel %vm460_vm2, %v607_v60, 0.0 }
  0xa0   : > { %v799_v44 = vsel %vm533_vm3, %v607_v60, 0.0  ;;  %v616_v9 = vadd.f32 %v615_v6, %v614_v34  ;;  %v656_v10 = vadd.f32 %v655_v7, %v654_v45  ;;  %v728_v11 = vadd.f32 %v727_v8, %v726_v46 }
  0xa1   : > { %v800_v12 = vadd.f32 %v799_v44, %v798_v47  ;;  %v617_v39 = vsel %vm337_vm0, %v608_v2, 0.0  ;;  %v657_v51 = vsel %vm387_vm1, %v608_v2, 0.0  ;;  %v729_v13 = vsel %vm460_vm2, %v608_v2, 0.0 }
  0xa2   : > { %v801_v14 = vsel %vm533_vm3, %v608_v2, 0.0  ;;  %v618_v15 = vadd.f32 %v617_v39, %v616_v9  ;;  %v658_v16 = vadd.f32 %v657_v51, %v656_v10  ;;  %v730_v17 = vadd.f32 %v729_v13, %v728_v11 }
  0xa3   : > { %v802_v19 = vadd.f32 %v801_v14, %v800_v12  ;;  %v619_v20 = vsel %vm337_vm0, %v609_v3, 0.0  ;;  %v659_v21 = vsel %vm387_vm1, %v609_v3, 0.0  ;;  %v731_v22 = vsel %vm460_vm2, %v609_v3, 0.0 }
  0xa4   : > { %v803_v23 = vsel %vm533_vm3, %v609_v3, 0.0  ;;  %v620_v24 = vadd.f32 %v619_v20, %v618_v15  ;;  %v660_v25 = vadd.f32 %v659_v21, %v658_v16  ;;  %v732_v26 = vadd.f32 %v731_v22, %v730_v17  ;;  %v287_v28 = vpop.xlane.xlu0 %286 }
  0xa5   : > { %v804_v27 = vadd.f32 %v803_v23, %v802_v19  ;;  %v610_v29 = vmul.f32 %v1328_v41, %v287_v28  ;;  %v290_v30 = vpop.xlane.xlu1 %289  ;;  %v352_v32 = vadd.f32 %v351_v5, %v350_v63  ;;  %v474_v34 = vsel %vm460_vm2, %v1394_v59, 0.0  ;;  %v1444_v28 = vld [vmem:[%s1922_s2] sm:$0x1] }
  0xa6   : > { %v293_v31 = vpop.xlane.xlu2 %292  ;;  %v611_v35 = vmul.f32 %v1347_v52, %v290_v30  ;;  %v1420_v38 = vadd.f32 %v401_v33, %v400_v0  ;;  %v475_v40 = vadd.f32 %v474_v34, %v473_v1  ;;  %v547_v2 = vsel %vm533_vm3, %v1394_v59, 0.0 }
  0xa7   : > { %v612_v37 = vmul.f32 %v1370_v18, %v293_v31  ;;  %v621_v36 = vsel %vm337_vm0, %v610_v29, 0.0  ;;  %v661_v41 = vsel %vm387_vm1, %v610_v29, 0.0  ;;  %v733_v42 = vsel %vm460_vm2, %v610_v29, 0.0 }
  0xa8   : > { %v805_v45 = vsel %vm533_vm3, %v610_v29, 0.0  ;;  %v622_v46 = vadd.f32 %v621_v36, %v620_v24  ;;  %v662_v47 = vadd.f32 %v661_v41, %v660_v25  ;;  %v734_v48 = vadd.f32 %v733_v42, %v732_v26 }
  0xa9   : > { %v806_v49 = vadd.f32 %v805_v45, %v804_v27  ;;  %v623_v50 = vsel %vm337_vm0, %v611_v35, 0.0  ;;  %v663_v52 = vsel %vm387_vm1, %v611_v35, 0.0  ;;  %v735_v18 = vsel %vm460_vm2, %v611_v35, 0.0 }
  0xaa   : > { %v624_v53 = vadd.f32 %v623_v50, %v622_v46  ;;  %v807_v54 = vsel %vm533_vm3, %v611_v35, 0.0  ;;  %v664_v55 = vadd.f32 %v663_v52, %v662_v47  ;;  %v736_v56 = vadd.f32 %v735_v18, %v734_v48 }
  0xab   : > { %v625_v57 = vsel %vm337_vm0, %v612_v37, 0.0  ;;  %v665_v60 = vsel %vm387_vm1, %v612_v37, 0.0  ;;  %v737_v61 = vsel %vm460_vm2, %v612_v37, 0.0  ;;  %v808_v63 = vadd.f32 %v807_v54, %v806_v49 }
  0xac   : > { %v626_v58 = vadd.f32 %v625_v57, %v624_v53  ;;  %v296_v62 = vpop.xlane.xlu0 %295  ;;  %v353_v0 = vrot.slane %v352_v32, 4  ;;  %v476_v1 = vrot.slane %v475_v40, 4  ;;  %v809_v3 = vsel %vm533_vm3, %v612_v37, 0.0 }
  0xad   : > { %v548_v5 = vadd.f32 %v547_v2, %v546_v4  ;;  %v613_v6 = vmul.f32 %v1384_v43, %v296_v62  ;;  %v666_v7 = vadd.f32 %v665_v60, %v664_v55  ;;  %v738_v8 = vadd.f32 %v737_v61, %v736_v56  ;;  %v1456_v2 = vld [vmem:[%s1923_s3 + $0x10] sm:$0xff] }
  0xae   : > { %v354_v44 = vadd.f32 %v353_v0, %v352_v32  ;;  %v477_v9 = vadd.f32 %v476_v1, %v475_v40  ;;  %v810_v51 = vadd.f32 %v809_v3, %v808_v63 }
  0xaf   : > { %v549_v10 = vrot.slane %v548_v5, 4  ;;  %v627_v11 = vsel %vm337_vm0, %v613_v6, 0.0  ;;  %v667_v12 = vsel %vm387_vm1, %v613_v6, 0.0  ;;  %v739_v39 = vsel %vm460_vm2, %v613_v6, 0.0 }
  0xb0   : > { %v355_v13 = vrot.slane %v354_v44, 2  ;;  %v478_v14 = vrot.slane %v477_v9, 2  ;;  %v628_v59 = vadd.f32 %v627_v11, %v626_v58  ;;  %v668_v16 = vadd.f32 %v667_v12, %v666_v7  ;;  %v1467_v7 = vld [vmem:[%s1923_s3 + $0x28] sm:$0xff] }
  0xb1   : > { %v550_v15 = vadd.f32 %v549_v10, %v548_v5  ;;  %v740_v4 = vadd.f32 %v739_v39, %v738_v8  ;;  %v811_v43 = vsel %vm533_vm3, %v613_v6, 0.0  ;;  %v1462_v6 = vld [vmem:[%s1923_s3 + $0x8] sm:$0xff]  ;;  %v1472_v8 = vld [vmem:[%s1923_s3 + $0x20] sm:$0xff] }
  0xb2   : > { %v356_v17 = vadd.f32 %v355_v13, %v354_v44  ;;  %v479_v19 = vadd.f32 %v478_v14, %v477_v9  ;;  %v629_v20 = vrot.slane %v628_v59, 4  ;;  %v669_v22 = vrot.slane %v668_v16, 4 }
  0xb3   : > { %v551_v21 = vrot.slane %v550_v15, 2  ;;  %v741_v23 = vrot.slane %v740_v4, 4  ;;  %v812_v24 = vadd.f32 %v811_v43, %v810_v51  ;;  %v1484_v51 = vld [vmem:[%s1923_s3] sm:$0xff] }
  0xb4   : > { %v357_v25 = vrot.slane %v356_v17, 1  ;;  %v480_v26 = vrot.slane %v479_v19, 1  ;;  %v630_v27 = vadd.f32 %v629_v20, %v628_v59  ;;  %v670_v30 = vadd.f32 %v669_v22, %v668_v16  ;;  %v1517_v22 = vld [vmem:[%s1923_s3 + $0x18] sm:$0xff] }
  0xb5   : > { %v552_v29 = vadd.f32 %v551_v21, %v550_v15  ;;  %v742_v31 = vadd.f32 %v741_v23, %v740_v4  ;;  %v813_v32 = vrot.slane %v812_v24, 4  ;;  %v1522_v23 = vld [vmem:[%s1923_s3 + $0x30] sm:$0xff] }
  0xb6   : > { %v358_v33 = vadd.f32 %v357_v25, %v356_v17  ;;  %v481_v34 = vadd.f32 %v480_v26, %v479_v19  ;;  %v631_v35 = vrot.slane %v630_v27, 2  ;;  %v671_v40 = vrot.slane %v670_v30, 2  ;;  %v1509_v19 = vld [vmem:[%s1923_s3 + $0x38] sm:$0xff] }
  0xb7   : > { %v553_v37 = vrot.slane %v552_v29, 1  ;;  %v743_v36 = vrot.slane %v742_v31, 2  ;;  %v814_v41 = vadd.f32 %v813_v32, %v812_v24 }
  0xb8   : > { %v360_v42 = vadd.f32 %v1444_v28, %v358_v33  ;;  %v482_v45 = vadd.f32 %v481_v34, %v1444_v28  ;;  %v632_v46 = vadd.f32 %v631_v35, %v630_v27  ;;  %v672_v48 = vadd.f32 %v671_v40, %v670_v30 }
  0xb9   : > { %v554_v47 = vadd.f32 %v553_v37, %v552_v29  ;;  %v744_v49 = vadd.f32 %v743_v36, %v742_v31  ;;  %v815_v50 = vrot.slane %v814_v41, 2 }
  0xba   : > { %v483_v52 = vmax.f32 %v482_v45, 0.0  ;;  %v633_v18 = vrot.slane %v632_v46, 1  ;;  %v673_v54 = vrot.slane %v672_v48, 1  ;;  %v361_v9 = vmax.f32 %v360_v42, 0.0 }
  0xbb   : > { %v555_v53 = vadd.f32 %v554_v47, %v1444_v28  ;;  %v745_v55 = vrot.slane %v744_v49, 1  ;;  %v816_v56 = vadd.f32 %v815_v50, %v814_v41 }
  0xbc   : > { %v634_v57 = vadd.f32 %v633_v18, %v632_v46  ;;  %v674_v58 = vadd.f32 %v673_v54, %v672_v48  ;;  %v1450_v62 = vperm.slane %v483_v52, 0  ;;  %v370_v20 = vperm.slane %v361_v9, 0 }
  0xbd   : > { %v817_v60 = vrot.slane %v816_v56, 1  ;;  %v746_v0 = vadd.f32 %v745_v55, %v744_v49  ;;  %v556_v44 = vmax.f32 %v555_v53, 0.0  ;;  %v403_v55 = vrot.slane %v1420_v38, 4 }
  0xbe   : > { %v635_v61 = vadd.f32 %v634_v57, %v1444_v28  ;;  %v675_v63 = vadd.f32 %v674_v58, %v1444_v28  ;;  %v1479_v12 = vmul.f32 %v1450_v62, %v1456_v2  ;;  %v1488_v13 = vmul.f32 %v1450_v62, %v1462_v6 }
  0xbf   : > { %v818_v1 = vadd.f32 %v817_v60, %v816_v56  ;;  %v747_v11 = vadd.f32 %v746_v0, %v1444_v28  ;;  %v1492_v14 = vmul.f32 %v1450_v62, %v1467_v7  ;;  %v1496_v59 = vmul.f32 %v1450_v62, %v1472_v8 }
  0xc0   : > { %v676_v3 = vmax.f32 %v675_v63, 0.0  ;;  %v636_v15 = vmax.f32 %v635_v61, 0.0  ;;  %v557_v17 = vperm.slane %v556_v44, 0  ;;  %v1536_v31 = vmul.f32 %v1450_v62, %v1509_v19 }
  0xc1   : > { %v819_v5 = vadd.f32 %v818_v1, %v1444_v28  ;;  %v748_v25 = vmax.f32 %v747_v11, 0.0  ;;  %v1581_v48 = vmul.f32 %v370_v20, %v1462_v6  ;;  %v1586_v50 = vmul.f32 %v370_v20, %v1517_v22 }
  0xc2   : > { %v1474_v10 = vperm.slane %v676_v3, 0  ;;  %v637_v24 = vperm.slane %v636_v15, 0  ;;  %v1529_v29 = vmul.f32 %v557_v17, %v1462_v6  ;;  %v1532_v30 = vmul.f32 %v557_v17, %v1484_v51 }
  0xc3   : > { %v820_v39 = vmax.f32 %v819_v5, 0.0  ;;  %v1539_v32 = vmul.f32 %v557_v17, %v1472_v8  ;;  %v1542_v33 = vmul.f32 %v557_v17, %v1517_v22  ;;  %v1545_v34 = vmul.f32 %v557_v17, %v1456_v2 }
  0xc4   : > { %v680_v16 = vmul.f32 %v1474_v10, %v1456_v2  ;;  %v679_v4 = vmul.f32 %v1474_v10, %v1462_v6  ;;  %v678_v43 = vmul.f32 %v1474_v10, %v1484_v51  ;;  %v683_v26 = vmul.f32 %v1474_v10, %v1467_v7 }
  0xc5   : > { %v1511_v21 = vperm.slane %v820_v39, 0  ;;  %v682_v27 = vmul.f32 %v1474_v10, %v1472_v8  ;;  %v1548_v35 = vmul.f32 %v557_v17, %v1509_v19  ;;  %v1551_v37 = vmul.f32 %v557_v17, %v1522_v23 }
  0xc6   : > { %698 = vrot.lane.b32.xlu0 %v680_v16, %s1249_s6  ;;  %696 = vrot.lane.b32.xlu1 %v679_v4, %s1249_s6  ;;  %v1554_v40 = vmul.f32 %v557_v17, %v1467_v7  ;;  %v681_v49 = vmul.f32 %v1474_v10, %v1517_v22  ;;  %v1589_v52 = vmul.f32 %v370_v20, %v1522_v23  ;;  %v749_v56 = vperm.slane %v748_v25, 0 }
  0xc7   : > { %694 = vrot.lane.b32.xlu2 %v678_v43, %s1249_s6  ;;  %v1558_v36 = vmul.f32 %v1511_v21, %v1472_v8  ;;  %v1562_v41 = vmul.f32 %v1511_v21, %v1517_v22  ;;  %v1566_v42 = vmul.f32 %v1511_v21, %v1456_v2  ;;  %v1570_v45 = vmul.f32 %v1511_v21, %v1509_v19 }
  0xc8   : > { %v1574_v46 = vmul.f32 %v1511_v21, %v1522_v23  ;;  %v1578_v47 = vmul.f32 %v1511_v21, %v1467_v7  ;;  %v1592_v18 = vmul.f32 %v370_v20, %v1456_v2  ;;  %v1597_v53 = vmul.f32 %v370_v20, %v1484_v51 }
  0xc9   : > { %v1600_v54 = vmul.f32 %v370_v20, %v1467_v7  ;;  %v1605_v57 = vmul.f32 %v370_v20, %v1472_v8  ;;  %v1608_v58 = vmul.f32 %v370_v20, %v1509_v19  ;;  %v1611_v60 = vmul.f32 %v637_v24, %v1456_v2 }
  0xca   : > { %v1614_v61 = vmul.f32 %v637_v24, %v1467_v7  ;;  %v1617_v63 = vmul.f32 %v637_v24, %v1462_v6  ;;  %v1620_v0 = vmul.f32 %v637_v24, %v1484_v51  ;;  %v1623_v1 = vmul.f32 %v637_v24, %v1472_v8 }
  0xcb   : > { %v1626_v3 = vmul.f32 %v637_v24, %v1517_v22  ;;  %v1629_v5 = vmul.f32 %v637_v24, %v1509_v19  ;;  %v1632_v44 = vmul.f32 %v637_v24, %v1522_v23  ;;  %v404_v9 = vadd.f32 %v403_v55, %v1420_v38 }
  0xcc   : > { %v750_v11 = vmul.f32 %v749_v56, %v1484_v51  ;;  %v685_v39 = vmul.f32 %v1474_v10, %v1509_v19  ;;  %v684_v15 = vmul.f32 %v1474_v10, %v1522_v23  ;;  %v753_v43 = vmul.f32 %v749_v56, %v1517_v22 }
  0xcd   : > { %v405_v16 = vrot.slane %v404_v9, 2  ;;  %v752_v38 = vmul.f32 %v749_v56, %v1456_v2  ;;  %v751_v17 = vmul.f32 %v749_v56, %v1462_v6  ;;  %v756_v24 = vmul.f32 %v749_v56, %v1522_v23 }
  0xce   : > { %704 = vrot.lane.b32.xlu0 %v683_v26, %s1249_s6  ;;  %702 = vrot.lane.b32.xlu1 %v682_v27, %s1249_s6  ;;  %v755_v25 = vmul.f32 %v749_v56, %v1467_v7  ;;  %v754_v26 = vmul.f32 %v749_v56, %v1472_v8  ;;  %v823_v55 = vmul.f32 %v1511_v21, %v1462_v6 }
  0xcf   : > { %700 = vrot.lane.b32.xlu2 %v681_v49, %s1249_s6  ;;  %v406_v4 = vadd.f32 %v405_v16, %v404_v9  ;;  %v822_v9 = vmul.f32 %v1511_v21, %v1484_v51 }
  0xd1   : > { %v407_v10 = vrot.slane %v406_v4, 1 }
  0xd3   : > { %v408_v20 = vadd.f32 %v407_v10, %v406_v4 }
  0xd5   : > { %v409_v27 = vadd.f32 %v408_v20, %v1444_v28 }
  0xd6   : > { %766 = vrot.lane.b32.xlu0 %v750_v11, %s1250_s13  ;;  %708 = vrot.lane.b32.xlu1 %v685_v39, %s1249_s6  ;;  %v757_v11 = vmul.f32 %v749_v56, %v1509_v19 }
  0xd7   : > { %706 = vrot.lane.b32.xlu2 %v684_v15, %s1249_s6  ;;  %v410_v49 = vmax.f32 %v409_v27, 0.0 }
  0xd9   : > { %v411_v39 = vperm.slane %v410_v49, 0 }
  0xdb   : > { %v414_v15 = vmul.f32 %v411_v39, %v1456_v2  ;;  %v412_v28 = vmul.f32 %v411_v39, %v1484_v51  ;;  %v413_v16 = vmul.f32 %v411_v39, %v1462_v6  ;;  %v417_v21 = vmul.f32 %v411_v39, %v1467_v7 }
  0xdc   : > { %v416_v56 = vmul.f32 %v411_v39, %v1472_v8  ;;  %v415_v4 = vmul.f32 %v411_v39, %v1517_v22  ;;  %v485_v2 = vmul.f32 %v1450_v62, %v1484_v51  ;;  %v419_v6 = vmul.f32 %v411_v39, %v1509_v19 }
  0xdd   : > { %v488_v7 = vmul.f32 %v1450_v62, %v1517_v22  ;;  %v491_v8 = vmul.f32 %v1450_v62, %v1522_v23 }
  0xde   : > { %772 = vrot.lane.b32.xlu0 %v753_v43, %s1250_s13  ;;  %770 = vrot.lane.b32.xlu1 %v752_v38, %s1250_s13  ;;  %v418_v43 = vmul.f32 %v411_v39, %v1522_v23 }
  0xdf   : > { %768 = vrot.lane.b32.xlu2 %v751_v17, %s1250_s13 }
  0xe6   : > { %778 = vrot.lane.b32.xlu0 %v756_v24, %s1250_s13  ;;  %776 = vrot.lane.b32.xlu1 %v755_v25, %s1250_s13 }
  0xe7   : > { %774 = vrot.lane.b32.xlu2 %v754_v26, %s1250_s13 }
  0xee   : > { %840 = vrot.lane.b32.xlu0 %v823_v55, %s1251_s14  ;;  %838 = vrot.lane.b32.xlu1 %v822_v9, %s1251_s14  ;;  %v299_v9 = vld [vmem:[%s1924_s4 + $0x10] sm:$0xff] }
  0xef   : > { %780 = vrot.lane.b32.xlu2 %v757_v11, %s1250_s13 }
  0xf6   : > { %432 = vrot.lane.b32.xlu0 %v414_v15, %s1249_s6  ;;  %428 = vrot.lane.b32.xlu1 %v412_v28, %s1249_s6  ;;  %v307_v15 = vmul.f32 2.0, %v299_v9 }
  0xf7   : > { %430 = vrot.lane.b32.xlu2 %v413_v16, %s1249_s6  ;;  %v302_v16 = vld [vmem:[%s1924_s4 + $0x28] sm:$0xff] }
  0xfe   : > { %438 = vrot.lane.b32.xlu0 %v417_v21, %s1249_s6  ;;  %436 = vrot.lane.b32.xlu1 %v416_v56, %s1249_s6 }
  0xff   : > { %434 = vrot.lane.b32.xlu2 %v415_v4, %s1249_s6 }
 0x106   : > { %501 = vrot.lane.b32.xlu0 %v485_v2, %s1250_s13  ;;  %442 = vrot.lane.b32.xlu1 %v419_v6, %s1249_s6  ;;  %v310_v2 = vmul.f32 2.0, %v302_v16 }
 0x107   : > { %440 = vrot.lane.b32.xlu2 %v418_v43, %s1249_s6 }
 0x10e   : > { %507 = vrot.lane.b32.xlu0 %v488_v7, %s1250_s13  ;;  %505 = vrot.lane.b32.xlu1 %v1479_v12, %s1250_s13 }
 0x10f   : > { %503 = vrot.lane.b32.xlu2 %v1488_v13, %s1250_s13 }
 0x116   : > { %513 = vrot.lane.b32.xlu0 %v491_v8, %s1250_s13  ;;  %511 = vrot.lane.b32.xlu1 %v1492_v14, %s1250_s13  ;;  %v298_v8 = vld [vmem:[%s1924_s4 + $0x8] sm:$0xff] }
 0x117   : > { %509 = vrot.lane.b32.xlu2 %v1496_v59, %s1250_s13 }
 0x11e   : > { %576 = vrot.lane.b32.xlu0 %v1529_v29, %s1251_s14  ;;  %574 = vrot.lane.b32.xlu1 %v1532_v30, %s1251_s14 }
 0x11f   : > { %515 = vrot.lane.b32.xlu2 %v1536_v31, %s1250_s13 }
 0x121   : > { %v1703_v12 = vpop.permute.xlu2 %694 }
 0x126   : > { %582 = vrot.lane.b32.xlu0 %v1539_v32, %s1251_s14  ;;  %580 = vrot.lane.b32.xlu1 %v1542_v33, %s1251_s14 }
 0x127   : > { %578 = vrot.lane.b32.xlu2 %v1545_v34, %s1251_s14 }
 0x129   : > { %v1711_v62 = vpop.permute.xlu2 %700 }
 0x12e   : > { %588 = vrot.lane.b32.xlu0 %v1548_v35, %s1251_s14  ;;  %586 = vrot.lane.b32.xlu1 %v1551_v37, %s1251_s14  ;;  %v300_v35 = vld [vmem:[%s1924_s4 + $0x18] sm:$0xff] }
 0x12f   : > { %584 = vrot.lane.b32.xlu2 %v1554_v40, %s1251_s14  ;;  %v308_v37 = vmul.f32 2.0, %v300_v35  ;;  %v297_v35 = vld [vmem:[%s1924_s4] sm:$0xff] }
 0x131   : > { %v1719_v51 = vpop.permute.xlu2 %706 }
 0x136   : > { %846 = vrot.lane.b32.xlu0 %v1558_v36, %s1251_s14  ;;  %844 = vrot.lane.b32.xlu1 %v1562_v41, %s1251_s14  ;;  %v382_v41 = vadd.f32 %v1586_v50, %v308_v37 }
 0x137   : > { %842 = vrot.lane.b32.xlu2 %v1566_v42, %s1251_s14 }
 0x138   : > { %v1727_v13 = vpop.permute.xlu0 %698  ;;  %v1729_v14 = vpop.permute.xlu1 %696 }
 0x139   : > { %v1731_v59 = vpop.permute.xlu2 %768 }
 0x13e   : > { %852 = vrot.lane.b32.xlu0 %v1570_v45, %s1251_s14  ;;  %850 = vrot.lane.b32.xlu1 %v1574_v46, %s1251_s14  ;;  %v303_v45 = vld [vmem:[%s1924_s4 + $0x30] sm:$0xff] }
 0x13f   : > { %848 = vrot.lane.b32.xlu2 %v1578_v47, %s1251_s14  ;;  %v311_v47 = vmul.f32 2.0, %v303_v45 }
 0x140   : > { %v1739_v19 = vpop.permute.xlu0 %704  ;;  %v1741_v22 = vpop.permute.xlu1 %702 }
 0x141   : > { %v1743_v23 = vpop.permute.xlu2 %774  ;;  %v385_v10 = vadd.f32 %v1589_v52, %v311_v47  ;;  %v381_v52 = vadd.f32 %v1592_v18, %v307_v15  ;;  %v384_v18 = vadd.f32 %v1600_v54, %v310_v2 }
 0x148   : > { %v1745_v29 = vpop.permute.xlu0 %766  ;;  %v1747_v30 = vpop.permute.xlu1 %708 }
 0x149   : > { %v1749_v31 = vpop.permute.xlu2 %780 }
 0x150   : > { %v1751_v32 = vpop.permute.xlu0 %772  ;;  %v771_v33 = vpop.permute.xlu1 %770 }
 0x151   : > { %v431_v34 = vpop.permute.xlu2 %430 }
 0x158   : > { %v1756_v40 = vpop.permute.xlu0 %778  ;;  %v777_v36 = vpop.permute.xlu1 %776 }
 0x159   : > { %v435_v42 = vpop.permute.xlu2 %434 }
 0x15a   : > { %v1762_v46 = vadd.f32 %v435_v42, %v382_v41  ;;  %v306_v41 = vmul.f32 2.0, %v298_v8  ;;  %v305_v42 = vmul.f32 2.0, %v297_v35 }
 0x15c   : > { %v380_v15 = vadd.f32 %v1581_v48, %v306_v41  ;;  %v304_v48 = vld [vmem:[%s1924_s4 + $0x38] sm:$0xff] }
 0x160   : > { %v1764_v38 = vpop.permute.xlu0 %840  ;;  %v1766_v17 = vpop.permute.xlu1 %838 }
 0x161   : > { %v441_v20 = vpop.permute.xlu2 %440 }
 0x162   : > { %v1769_v24 = vadd.f32 %v441_v20, %v385_v10  ;;  %v301_v20 = vld [vmem:[%s1924_s4 + $0x20] sm:$0xff] }
 0x168   : > { %v433_v25 = vpop.permute.xlu0 %432  ;;  %v429_v26 = vpop.permute.xlu1 %428 }
 0x169   : > { %v504_v50 = vpop.permute.xlu2 %503  ;;  %v454_v21 = vadd.f32 %v433_v25, %v381_v52  ;;  %v379_v52 = vadd.f32 %v1597_v53, %v305_v42 }
 0x170   : > { %v439_v27 = vpop.permute.xlu0 %438  ;;  %v437_v49 = vpop.permute.xlu1 %436 }
 0x171   : > { %v510_v55 = vpop.permute.xlu2 %509  ;;  %v457_v45 = vadd.f32 %v439_v27, %v384_v18 }
 0x178   : > { %v502_v11 = vpop.permute.xlu0 %501  ;;  %v1774_v39 = vpop.permute.xlu1 %442 }
 0x179   : > { %v1776_v28 = vpop.permute.xlu2 %515 }
 0x180   : > { %v508_v56 = vpop.permute.xlu0 %507  ;;  %v506_v4 = vpop.permute.xlu1 %505 }
 0x181   : > { %v527_v6 = vadd.f32 %v506_v4, %v454_v21  ;;  %v579_v43 = vpop.permute.xlu2 %578  ;;  %v309_v21 = vmul.f32 2.0, %v301_v20  ;;  %v452_v4 = vadd.f32 %v429_v26, %v379_v52 }
 0x183   : > { %v600_v7 = vadd.f32 %v579_v43, %v527_v6  ;;  %v525_v6 = vadd.f32 %v502_v11, %v452_v4 }
 0x185   : > { %v648_v37 = vadd.f32 %v1611_v60, %v600_v7  ;;  %v453_v60 = vadd.f32 %v431_v34, %v380_v15  ;;  %v383_v7 = vadd.f32 %v1605_v57, %v309_v21 }
 0x187   : > { %v720_v54 = vadd.f32 %v1727_v13, %v648_v37  ;;  %v526_v2 = vadd.f32 %v504_v50, %v453_v60  ;;  %v456_v26 = vadd.f32 %v437_v49, %v383_v7 }
 0x188   : > { %v514_v47 = vpop.permute.xlu0 %513  ;;  %v512_v10 = vpop.permute.xlu1 %511 }
 0x189   : > { %v530_v25 = vadd.f32 %v512_v10, %v457_v45  ;;  %v585_v9 = vpop.permute.xlu2 %584  ;;  %v792_v18 = vadd.f32 %v771_v33, %v720_v54  ;;  %v529_v42 = vadd.f32 %v510_v55, %v456_v26  ;;  %v528_v45 = vadd.f32 %v508_v56, %v1762_v46 }
 0x18b   : > { %v603_v16 = vadd.f32 %v585_v9, %v530_v25  ;;  %v1252_v25 = vmov 0  }
 0x18c   : > { %1192 = vset.pattern.permute.xlu0 %v1252_v25  ;;  %1191 = vset.pattern.permute.xlu1 %v1252_v25 }
 0x18d   : > { %v651_v27 = vadd.f32 %v1614_v61, %v603_v16  ;;  %1190 = vset.pattern.permute.xlu2 %v1252_v25 }
 0x18f   : > { %v723_v43 = vadd.f32 %v1739_v19, %v651_v27  ;;  %v312_v19 = vmul.f32 2.0, %v304_v48 }
 0x190   : > { %v577_v8 = vpop.permute.xlu0 %576  ;;  %v575_v35 = vpop.permute.xlu1 %574 }
 0x191   : > { %v599_v53 = vadd.f32 %v577_v8, %v526_v2  ;;  %v598_v41 = vadd.f32 %v575_v35, %v525_v6  ;;  %v843_v13 = vpop.permute.xlu2 %842  ;;  %v795_v34 = vadd.f32 %v777_v36, %v723_v43  ;;  %v386_v49 = vadd.f32 %v1608_v58, %v312_v19 }
 0x192   : > { %v864_v37 = vadd.f32 %v843_v13, %v792_v18 }
 0x193   : > { %v647_v61 = vadd.f32 %v1617_v63, %v599_v53  ;;  %v646_v50 = vadd.f32 %v1620_v0, %v598_v41  ;;  %v459_v46 = vadd.f32 %v1774_v39, %v386_v49 }
 0x194   : > { %v1168_v11 = vmul.f32 -1.442695, %v864_v37 }
 0x195   : > { %v719_v57 = vadd.f32 %v1729_v14, %v647_v61  ;;  %v718_v33 = vadd.f32 %v1703_v12, %v646_v50 }
 0x196   : > { %1193 = vpow2.f32 %v1168_v11 }
 0x197   : > { %v791_v10 = vadd.f32 %v1731_v59, %v719_v57  ;;  %v790_v36 = vadd.f32 %v1745_v29, %v718_v33 }
 0x198   : > { %v583_v20 = vpop.permute.xlu0 %582  ;;  %v581_v63 = vpop.permute.xlu1 %580 }
 0x199   : > { %v863_v0 = vadd.f32 %v1764_v38, %v791_v10  ;;  %v862_v14 = vadd.f32 %v1766_v17, %v790_v36  ;;  %v602_v12 = vadd.f32 %v583_v20, %v529_v42  ;;  %v601_v55 = vadd.f32 %v581_v63, %v528_v45  ;;  %v849_v9 = vpop.permute.xlu2 %848 }
 0x19a   : > { %v867_v59 = vadd.f32 %v849_v9, %v795_v34  ;;  %v532_v38 = vadd.f32 %v1776_v28, %v459_v46  ;;  %v531_v17 = vadd.f32 %v514_v47, %v1769_v24 }
 0x19b   : > { %v1167_v56 = vmul.f32 -1.442695, %v863_v0  ;;  %v1166_v29 = vmul.f32 -1.442695, %v862_v14  ;;  %v650_v58 = vadd.f32 %v1623_v1, %v602_v12  ;;  %v649_v15 = vadd.f32 %v1626_v3, %v601_v55 }
 0x19c   : > { %v1194_v52 = vpop.eup %1193  ;;  %v1171_v21 = vmul.f32 -1.442695, %v867_v59 }
 0x19d   : > { %1195 = vpow2.f32 %v1167_v56  ;;  %v896_v16 = vadd.f32 1.0, %v1194_v52  ;;  %v722_v27 = vadd.f32 %v1741_v22, %v650_v58  ;;  %v721_v6 = vadd.f32 %v1711_v62, %v649_v15 }
 0x19e   : > { %1197 = vpow2.f32 %v1166_v29 }
 0x19f   : > { %1199 = vrcp.f32 %v896_v16  ;;  %v794_v22 = vadd.f32 %v1743_v23, %v722_v27  ;;  %v793_v8 = vadd.f32 %v1751_v32, %v721_v6  ;;  %v941_v18 = vand.u32 2147483647, %v896_v16 }
 0x1a0   : > { %v589_v54 = vpop.permute.xlu0 %588  ;;  %v587_v60 = vpop.permute.xlu1 %586  ;;  %1201 = vpow2.f32 %v1171_v21  ;;  %v943_v13 = vand.u32 2147483648, %v896_v16  ;;  %vm937_vm5 = vweird.f32 %v896_v16 }
 0x1a1   : > { %v605_v39 = vadd.f32 %v589_v54, %v532_v38  ;;  %v604_v4 = vadd.f32 %v587_v60, %v531_v17  ;;  %vm942_vm6 = vcmp.eq.f32.partialorder %v941_v18, 8.507059e+37 }
 0x1a2   : > { %v944_v57 = vor.u32 1.1754944e-38, %v943_v13 }
 0x1a3   : > { %v1196_v2 = vpop.eup %1195  ;;  %v653_v1 = vadd.f32 %v1629_v5, %v605_v39  ;;  %v652_v3 = vadd.f32 %v1632_v44, %v604_v4 }
 0x1a4   : > { %v1198_v43 = vpop.eup %1197  ;;  %v1821_v28 = vadd.f32 1.0, %v1196_v2 }
 0x1a5   : > { %v1200_v24 = vpop.eup %1199  ;;  %v1823_v47 = vadd.f32 1.0, %v1198_v43  ;;  %v725_v41 = vadd.f32 %v1747_v30, %v653_v1  ;;  %v724_v34 = vadd.f32 %v1719_v51, %v652_v3 }
 0x1a6   : > { %1203 = vrcp.f32 %v1821_v28  ;;  %v933_v7 = vmul.f32 %v1200_v24, %v896_v16  ;;  %v1202_v62 = vpop.eup %1201  ;;  %vm938_vm4 = vweird.f32 %v1200_v24  ;;  %v926_v36 = vand.u32 2147483647, %v1821_v28 }
 0x1a7   : > { %1205 = vrcp.f32 %v1823_v47  ;;  %v1831_v23 = vadd.f32 1.0, %v1202_v62  ;;  %v797_v11 = vadd.f32 %v1749_v31, %v725_v41  ;;  %vm939_vm7 = vmor %vm937_vm5, %vm938_vm4  ;;  %v796_v51 = vadd.f32 %v1756_v40, %v724_v34 }
 0x1a8   : > { %v847_v5 = vpop.permute.xlu0 %846  ;;  %v845_v35 = vpop.permute.xlu1 %844  ;;  %v934_v44 = vsub.f32 1.0, %v933_v7  ;;  %v928_v49 = vand.u32 2147483648, %v1821_v28  ;;  %v913_v0 = vand.u32 2147483648, %v1823_v47  ;;  %vm922_vm9 = vweird.f32 %v1821_v28 }
 0x1a9   : > { %v866_v48 = vadd.f32 %v847_v5, %v794_v22  ;;  %v865_v53 = vadd.f32 %v845_v35, %v793_v8  ;;  %v911_v9 = vand.u32 2147483647, %v1823_v47  ;;  %vm927_vm11 = vcmp.eq.f32.partialorder %v926_v36, 8.507059e+37 }
 0x1aa   : > { %v935_v26 = vmul.f32 %v1200_v24, %v934_v44  ;;  %vm907_vm12 = vweird.f32 %v1823_v47  ;;  %v929_v52 = vor.u32 1.1754944e-38, %v928_v49  ;;  %v914_v21 = vor.u32 1.1754944e-38, %v913_v0 }
 0x1ab   : > { %v1170_v37 = vmul.f32 -1.442695, %v866_v48  ;;  %v1169_v61 = vmul.f32 -1.442695, %v865_v53  ;;  %vm912_vm15 = vcmp.eq.f32.partialorder %v911_v9, 8.507059e+37  ;;  %v988_v36 = vand.u32 2147483648, %v1831_v23 }
 0x1ac   : > { %v1204_v50 = vpop.eup %1203  ;;  %v936_v32 = vadd.f32 %v1200_v24, %v935_v26  ;;  %v986_v26 = vand.u32 2147483647, %v1831_v23 }
 0x1ad   : > { %v1206_v19 = vpop.eup %1205  ;;  %1207 = vpow2.f32 %v1170_v37  ;;  %v918_v30 = vmul.f32 %v1204_v50, %v1821_v28  ;;  %vm923_vm8 = vweird.f32 %v1204_v50 }
 0x1ae   : > { %1209 = vpow2.f32 %v1169_v61  ;;  %v940_v33 = vsel %vm939_vm7, %v1200_v24, %v936_v32  ;;  %v903_v42 = vmul.f32 %v1206_v19, %v1823_v47  ;;  %vm908_vm10 = vweird.f32 %v1206_v19  ;;  %vm924_vm13 = vmor %vm922_vm9, %vm923_vm8 }
 0x1af   : > { %v945_v45 = vsel %vm942_vm6, %v944_v57, %v940_v33  ;;  %v919_v10 = vsub.f32 1.0, %v918_v30  ;;  %1211 = vrcp.f32 %v1831_v23  ;;  %vm909_vm14 = vmor %vm907_vm12, %vm908_vm10  ;;  %vm982_vm9 = vweird.f32 %v1831_v23 }
 0x1b0   : > { %v853_v20 = vpop.permute.xlu0 %852  ;;  %v851_v31 = vpop.permute.xlu1 %850  ;;  %v1024_v63 = vsub.f32 1.0, %v945_v45  ;;  %v904_v25 = vsub.f32 1.0, %v903_v42  ;;  %vm987_vm12 = vcmp.eq.f32.partialorder %v986_v26, 8.507059e+37 }
 0x1b1   : > { %v869_v14 = vadd.f32 %v853_v20, %v797_v11  ;;  %v868_v12 = vadd.f32 %v851_v31, %v796_v51  ;;  %v920_v40 = vmul.f32 %v1204_v50, %v919_v10 }
 0x1b2   : > { %1042 = vperm.xlu0 %1192, %v1024_v63   ;;  %v905_v55 = vmul.f32 %v1206_v19, %v904_v25 }
 0x1b3   : > { %v1208_v46 = vpop.eup %1207  ;;  %v1173_v59 = vmul.f32 -1.442695, %v869_v14  ;;  %v921_v56 = vadd.f32 %v1204_v50, %v920_v40  ;;  %v1172_v15 = vmul.f32 -1.442695, %v868_v12 }
 0x1b4   : > { %v1210_v29 = vpop.eup %1209  ;;  %v898_v58 = vadd.f32 1.0, %v1208_v46  ;;  %v906_v16 = vadd.f32 %v1206_v19, %v905_v55  ;;  %v989_v55 = vor.u32 1.1754944e-38, %v988_v36 }
 0x1b5   : > { %v897_v38 = vadd.f32 1.0, %v1210_v29  ;;  %1213 = vpow2.f32 %v1173_v59  ;;  %v925_v17 = vsel %vm924_vm13, %v1204_v50, %v921_v56  ;;  %v1845_v54 = vpop.eup %1211 }
 0x1b6   : > { %1215 = vrcp.f32 %v898_v58  ;;  %v930_v60 = vsel %vm927_vm11, %v929_v52, %v925_v17  ;;  %v910_v39 = vsel %vm909_vm14, %v1206_v19, %v906_v16  ;;  %v978_v1 = vmul.f32 %v1845_v54, %v1831_v23 }
 0x1b7   : > { %1217 = vrcp.f32 %v897_v38  ;;  %v1023_v4 = vsub.f32 1.0, %v930_v60  ;;  %v915_v27 = vsel %vm912_vm15, %v914_v21, %v910_v39  ;;  %v971_v35 = vand.u32 2147483647, %v898_v58  ;;  %v1225_v39 = vld [vmem:[%s1299_s23] sm:$0xff] }
 0x1b8   : > { %1219 = vpow2.f32 %v1172_v15  ;;  %v1022_v2 = vsub.f32 1.0, %v915_v27  ;;  %v979_v22 = vsub.f32 1.0, %v978_v1  ;;  %v973_v44 = vand.u32 2147483648, %v898_v58  ;;  %v1226_v27 = vld [vmem:[%s1299_s23 + $0x8] sm:$0xff] }
 0x1b9   : > { %1037 = vperm.xlu1 %1191, %v1023_v4   ;;  %v958_v48 = vand.u32 2147483648, %v897_v38  ;;  %v956_v41 = vand.u32 2147483647, %v897_v38  ;;  %vm967_vm2 = vweird.f32 %v898_v58  ;;  %vm952_vm4 = vweird.f32 %v897_v38 }
 0x1ba   : > { %1032 = vperm.xlu2 %1190, %v1022_v2   ;;  %v980_v13 = vmul.f32 %v1845_v54, %v979_v22  ;;  %v974_v61 = vor.u32 1.1754944e-38, %v973_v44  ;;  %vm983_vm5 = vweird.f32 %v1845_v54  ;;  %vm972_vm6 = vcmp.eq.f32.partialorder %v971_v35, 8.507059e+37  ;;  %v1230_v22 = vld [vmem:[%s1299_s23 + $0x38] sm:$0xff]  ;;  %v1231_v35 = vld [vmem:[%s1299_s23 + $0x10] sm:$0xff] }
 0x1bb   : > { %v1214_v3 = vpop.eup %1213  ;;  %v959_v19 = vor.u32 1.1754944e-38, %v958_v48  ;;  %vm957_vm8 = vcmp.eq.f32.partialorder %v956_v41, 8.507059e+37  ;;  %vm1867_vm11 = vmor %vm982_vm9, %vm983_vm5 }
 0x1bc   : > { %v1216_v6 = vpop.eup %1215  ;;  %v1849_v43 = vadd.f32 1.0, %v1214_v3  ;;  %v981_v51 = vadd.f32 %v1845_v54, %v980_v13  ;;  %v1234_v13 = vld [vmem:[%s1299_s23 + $0x58] sm:$0xff] }
 0x1bd   : > { %v1218_v28 = vpop.eup %1217  ;;  %v963_v24 = vmul.f32 %v1216_v6, %v898_v58  ;;  %vm968_vm0 = vweird.f32 %v1216_v6 }
 0x1be   : > { %v1220_v47 = vpop.eup %1219  ;;  %1221 = vrcp.f32 %v1849_v43  ;;  %v948_v7 = vmul.f32 %v1218_v28, %v897_v38  ;;  %vm953_vm1 = vweird.f32 %v1218_v28  ;;  %vm969_vm3 = vmor %vm967_vm2, %vm968_vm0  ;;  %v1018_v20 = vand.u32 2147483648, %v1849_v43 }
 0x1bf   : > { %v1852_v8 = vadd.f32 1.0, %v1220_v47  ;;  %v964_v5 = vsub.f32 1.0, %v963_v24  ;;  %vm954_vm7 = vmor %vm952_vm4, %vm953_vm1  ;;  %v1016_v25 = vand.u32 2147483647, %v1849_v43  ;;  %v985_v12 = vsel %vm1867_vm11, %v1845_v54, %v981_v51  ;;  %v1229_v47 = vld [vmem:[%s1299_s23 + $0x30] sm:$0xff] }
 0x1c0   : > { %v949_v18 = vsub.f32 1.0, %v948_v7  ;;  %vm1012_vm13 = vweird.f32 %v1849_v43  ;;  %v1019_v9 = vor.u32 1.1754944e-38, %v1018_v20  ;;  %v990_v29 = vsel %vm987_vm12, %v989_v55, %v985_v12 }
 0x1c1   : > { %1223 = vrcp.f32 %v1852_v8  ;;  %v965_v62 = vmul.f32 %v1216_v6, %v964_v5  ;;  %v1003_v23 = vand.u32 2147483648, %v1852_v8  ;;  %v1001_v59 = vand.u32 2147483647, %v1852_v8 }
 0x1c2   : > { %v950_v53 = vmul.f32 %v1218_v28, %v949_v18  ;;  %vm1017_vm0 = vcmp.eq.f32.partialorder %v1016_v25, 8.507059e+37  ;;  %vm997_vm1 = vweird.f32 %v1852_v8  ;;  %v1027_v17 = vsub.f32 1.0, %v990_v29  ;;  %v1232_v18 = vld [vmem:[%s1299_s23 + $0x18] sm:$0xff] }
 0x1c3   : > { %v966_v34 = vadd.f32 %v1216_v6, %v965_v62  ;;  %v1004_v16 = vor.u32 1.1754944e-38, %v1003_v23 }
 0x1c4   : > { %v1222_v37 = vpop.eup %1221  ;;  %v951_v50 = vadd.f32 %v1218_v28, %v950_v53  ;;  %v1233_v53 = vld [vmem:[%s1299_s23 + $0x50] sm:$0xff] }
 0x1c5   : > { %v970_v32 = vsel %vm969_vm3, %v1216_v6, %v966_v34  ;;  %v1008_v11 = vmul.f32 %v1222_v37, %v1849_v43  ;;  %vm1013_vm10 = vweird.f32 %v1222_v37  ;;  %vm1002_vm3 = vcmp.eq.f32.partialorder %v1001_v59, 8.507059e+37  ;;  %v1227_v6 = vld [vmem:[%s1299_s23 + $0x20] sm:$0xff] }
 0x1c6   : > { %v975_v57 = vsel %vm972_vm6, %v974_v61, %v970_v32  ;;  %v955_v30 = vsel %vm954_vm7, %v1218_v28, %v951_v50  ;;  %vm1014_vm14 = vmor %vm1012_vm13, %vm1013_vm10  ;;  %v1228_v28 = vld [vmem:[%s1299_s23 + $0x28] sm:$0xff] }
 0x1c7   : > { %v1224_v33 = vpop.eup %1223  ;;  %v1026_v42 = vsub.f32 1.0, %v975_v57  ;;  %v960_v45 = vsel %vm957_vm8, %v959_v19, %v955_v30  ;;  %v1009_v10 = vsub.f32 1.0, %v1008_v11  ;;  %v1236_v50 = vld [vmem:[%s1299_s23 + $0x48] sm:$0xff]  ;;  %v1237_v11 = vld [vmem:[%s1299_s23 + $0x70] sm:$0xff]  ;;  %v1238_v30 = vld [vmem:[%s1299_s23 + $0x78] sm:$0xff] }
 0x1c8   : > { %v1025_v49 = vsub.f32 1.0, %v960_v45  ;;  %v993_v31 = vmul.f32 %v1224_v33, %v1852_v8  ;;  %vm998_vm15 = vweird.f32 %v1224_v33 }
 0x1c9   : > { %1052 = vperm.xlu1 %1191, %v1026_v42   ;;  %v1010_v63 = vmul.f32 %v1222_v37, %v1009_v10  ;;  %vm999_vm2 = vmor %vm997_vm1, %vm998_vm15  ;;  %v1239_v42 = vld [vmem:[%s1299_s23 + $0x60] sm:$0xff]  ;;  %v1240_v10 = vld [vmem:[%s1299_s23 + $0x68] sm:$0xff] }
 0x1ca   : > { %1047 = vperm.xlu2 %1190, %v1025_v49   ;;  %v994_v14 = vsub.f32 1.0, %v993_v31 }
 0x1cb   : > { %v1011_v40 = vadd.f32 %v1222_v37, %v1010_v63 }
 0x1cc   : > { %v995_v46 = vmul.f32 %v1224_v33, %v994_v14 }
 0x1cd   : > { %v1015_v56 = vsel %vm1014_vm14, %v1222_v37, %v1011_v40  ;;  %v1235_v37 = vld [vmem:[%s1299_s23 + $0x40] sm:$0xff] }
 0x1ce   : > { %v1020_v58 = vsel %vm1017_vm0, %v1019_v9, %v1015_v56  ;;  %v996_v15 = vadd.f32 %v1224_v33, %v995_v46 }
 0x1cf   : > { %v1029_v52 = vsub.f32 1.0, %v1020_v58 }
 0x1d0   : > { %v1000_v38 = vsel %vm999_vm2, %v1224_v33, %v996_v15 }
 0x1d1   : > { %1067 = vperm.xlu0 %1192, %v1029_v52   ;;  %v1005_v21 = vsel %vm1002_vm3, %v1004_v16, %v1000_v38 }
 0x1d2   : > { %v1028_v54 = vsub.f32 1.0, %v1005_v21  ;;  %1057 = vperm.xlu2 %1190, %v1027_v17  }
 0x1d4   : > { %1062 = vperm.xlu1 %1191, %v1028_v54  }
 0x214   : > { %v1033_v60 = vpop.permute.xlu2 %1032 }
 0x215   : > { %v1070_v4 = vmul.f32 %v1225_v39, %v1033_v60  ;;  %v1071_v2 = vmul.f32 %v1226_v27, %v1033_v60 }
 0x217   : > { %1086 = vst [vmem:[%s1883_s12] sm:$0xff] %v1070_v4 }
 0x218   : > { %1087 = vst [vmem:[%s1883_s12 + $0x8] sm:$0xff] %v1071_v2 }
 0x224   : > { %v1043_v1 = vpop.permute.xlu0 %1042  ;;  %v1048_v3 = vpop.permute.xlu2 %1047 }
 0x225   : > { %v1074_v43 = vmul.f32 %v1227_v6, %v1043_v1  ;;  %v1075_v24 = vmul.f32 %v1228_v28, %v1043_v1  ;;  %v1076_v7 = vmul.f32 %v1229_v47, %v1048_v3  ;;  %v1077_v8 = vmul.f32 %v1230_v22, %v1048_v3 }
 0x227   : > { %1090 = vst [vmem:[%s1883_s12 + $0x20] sm:$0xff] %v1074_v43 }
 0x228   : > { %1091 = vst [vmem:[%s1883_s12 + $0x28] sm:$0xff] %v1075_v24 }
 0x229   : > { %1092 = vst [vmem:[%s1883_s12 + $0x30] sm:$0xff] %v1076_v7 }
 0x22a   : > { %1093 = vst [vmem:[%s1883_s12 + $0x38] sm:$0xff] %v1077_v8 }
 0x22b   : > { %v1038_v5 = vpop.permute.xlu1 %1037 }
 0x22c   : > { %v1072_v44 = vmul.f32 %v1231_v35, %v1038_v5  ;;  %v1073_v62 = vmul.f32 %v1232_v18, %v1038_v5  ;;  %v1058_v48 = vpop.permute.xlu2 %1057 }
 0x22d   : > { %v1080_v41 = vmul.f32 %v1233_v53, %v1058_v48  ;;  %v1081_v34 = vmul.f32 %v1234_v13, %v1058_v48 }
 0x22e   : > { %1088 = vst [vmem:[%s1883_s12 + $0x10] sm:$0xff] %v1072_v44 }
 0x22f   : > { %1089 = vst [vmem:[%s1883_s12 + $0x18] sm:$0xff] %v1073_v62 }
 0x230   : > { %1096 = vst [vmem:[%s1883_s12 + $0x50] sm:$0xff] %v1080_v41 }
 0x231   : > { %1097 = vst [vmem:[%s1883_s12 + $0x58] sm:$0xff] %v1081_v34 }
 0x23b   : > { %v1053_v26 = vpop.permute.xlu1 %1052 }
 0x23c   : > { %v1078_v61 = vmul.f32 %v1235_v37, %v1053_v26  ;;  %v1079_v32 = vmul.f32 %v1236_v50, %v1053_v26 }
 0x23e   : > { %1094 = vst [vmem:[%s1883_s12 + $0x40] sm:$0xff] %v1078_v61 }
 0x23f   : > { %1095 = vst [vmem:[%s1883_s12 + $0x48] sm:$0xff] %v1079_v32 }
 0x243   : > { %v1068_v19 = vpop.permute.xlu0 %1067 }
 0x244   : > { %v1084_v57 = vmul.f32 %v1237_v11, %v1068_v19  ;;  %v1085_v51 = vmul.f32 %v1238_v30, %v1068_v19 }
 0x246   : > { %1100 = vst [vmem:[%s1883_s12 + $0x70] sm:$0xff] %v1084_v57  ;;  %v1063_v33 = vpop.permute.xlu1 %1062 }
 0x247   : > { %1101 = vst [vmem:[%s1883_s12 + $0x78] sm:$0xff] %v1085_v51  ;;  %v1082_v45 = vmul.f32 %v1239_v42, %v1063_v33  ;;  %v1083_v36 = vmul.f32 %v1240_v10, %v1063_v33 }
 0x249   : > { %1098 = vst [vmem:[%s1883_s12 + $0x60] sm:$0xff] %v1082_v45 }
 0x24a   : > { %1099 = vst [vmem:[%s1883_s12 + $0x68] sm:$0xff] %v1083_v36 }
 0x24b PF: > { %s15_s18 = sadd.s32 1, %s1247_s18  }
 0x24c   : > { %p12_p4 = scmp.ge.s32.totalorder %s15_s18, 4  }
 0x24e   :  { %14 = sbr.rel (!%p12_p4) target bundleno = 1 (0x1), region = 70 }

</bundles_post_ra>
